<compile_context>
chip_gen: v7x
topology: tpu7x:2x2x1
jax: 0.10.0
libtpu: 0.0.40
codegen_flags: <defaults>
</compile_context>

<pallas_src>
import functools

import jax
import jax.numpy as jnp
from jax.experimental import pallas as pl
from jax.experimental.pallas import tpu as pltpu


def _round_up(n, m):
    return ((n + m - 1) // m) * m


# Per-block VMEM budgets (bytes).  Double-buffered x + resident w + outputs
# stays well under v5e's 16 MiB scoped-VMEM default on every generation.
_X_BLOCK_BUDGET = 2 * 1024 * 1024
_W_BLOCK_BUDGET = 2 * 1024 * 1024


# ---------------------------------------------------------------------------
# Shared finalize: votes + per-row reductions, written lane-dense.
# ---------------------------------------------------------------------------
def _finalize(acc, b_row, post_row, y_col, out_ref, stats_ref):
    # Votes: threshold(x @ w + b > 0).  Padded voter columns have w = b =
    # post = 0, so they vote 0 and contribute nothing to the reductions.
    out = (acc + b_row > 0.0).astype(jnp.float32)                     # (tb, Mp)
    out_ref[...] = out

    # classes are statically {0.0, 1.0} (binary voters).
    s1 = jnp.sum(out * post_row, axis=1, keepdims=True)               # (tb, 1)
    s0 = jnp.sum((1.0 - out) * post_row, axis=1, keepdims=True)       # exact
    margin = jnp.where(y_col == 1.0, s1 - s0, s0 - s1)
    pred = (s1 > s0).astype(jnp.float32)                              # tie -> 0

    # Pack margin | pred | score0 | score1 into a 128-lane slab with VPU
    # selects (no concatenate / XLU relayout, single unmasked store).
    col = jax.lax.broadcasted_iota(jnp.int32, stats_ref.shape, 1)
    stats_ref[...] = jnp.where(col == 0, margin,
                     jnp.where(col == 1, pred,
                     jnp.where(col == 2, s0,
                     jnp.where(col == 3, s1, 0.0))))


# ---------------------------------------------------------------------------
# Hot kernel, whole-D variant: single batch grid axis, no accumulator.
# ---------------------------------------------------------------------------
def _mv_vote_whole_d_kernel(x_ref, w_ref, b_ref, post_ref, y_ref,
                            out_ref, stats_ref):
    acc = jnp.dot(x_ref[...].astype(jnp.bfloat16), w_ref[...],
                  preferred_element_type=jnp.float32)                 # (tb, Mp)
    _finalize(acc, b_ref[...], post_ref[...], y_ref[...], out_ref, stats_ref)


# ---------------------------------------------------------------------------
# Hot kernel, k-reduction variant (large D): f32 VMEM accumulator.
# ---------------------------------------------------------------------------
def _mv_vote_kred_kernel(x_ref, w_ref, b_ref, post_ref, y_ref,
                         out_ref, stats_ref, acc_ref):
    k = pl.program_id(1)

    @pl.when(k == 0)
    def _():
        acc_ref[...] = jnp.zeros_like(acc_ref)

    acc_ref[...] += jnp.dot(x_ref[...].astype(jnp.bfloat16), w_ref[...],
                            preferred_element_type=jnp.float32)

    @pl.when(k == pl.num_programs(1) - 1)
    def _():
        _finalize(acc_ref[...], b_ref[...], post_ref[...], y_ref[...],
                  out_ref, stats_ref)


# ---------------------------------------------------------------------------
# Wrapper
# ---------------------------------------------------------------------------
def majority_vote_diff_forward(x, y, w, b, post_logits, prior, *,
                               tb=512, tk=2048, force_kred=False):
    """MajorityVoteDiff forward.  Returns (out, margin, score, pred, post, kl).

    Labels y must be in {0.0, 1.0} (binary voters) -- static design constraint.
    """
    B = x.shape[0]
    xf = x.reshape(B, -1)                                             # f32, no cast
    D = xf.shape[1]
    D_w, M = w.shape
    assert D_w == D

    # --- batch-independent part: softmax over voters + KL(post || prior) ---
    # M elements -> plain jnp; XLA fuses this, no extra pallas_call launch.
    pvec = jax.nn.softmax(
        jnp.clip(post_logits.reshape(-1).astype(jnp.float32), -1e10, 1e10))
    prior_v = prior.reshape(-1).astype(jnp.float32)
    kl = (jnp.sum(jnp.where(pvec == 0.0, 0.0, pvec * jnp.log(pvec)))
          - jnp.sum(jnp.where(pvec == 0.0, 0.0, pvec * jnp.log(prior_v))))

    # --- tiling ------------------------------------------------------------
    Mp = _round_up(M, 128)                        # lane-dense voter dim
    Dp = _round_up(D, 128)

    # Whole-D block if w (resident) and a minimal x block fit the budgets.
    whole_d = (not force_kred
               and Dp * Mp * 2 <= _W_BLOCK_BUDGET
               and 8 * Dp * 4 <= _X_BLOCK_BUDGET)

    if whole_d:
        d_block = Dp
        Dp2 = Dp
    else:
        tk = max(128, min(_round_up(tk, 128), Dp))
        d_block = tk
        Dp2 = _round_up(D, tk)

    # Batch tile: keep >= 2 batch tiles (v7x megacore), respect VMEM budget.
    half_cap = _round_up(max(1, (B + 1) // 2), 8)
    max_tb = max(8, (_X_BLOCK_BUDGET // (d_block * 4)) // 8 * 8)
    tb = max(8, min(_round_up(tb, 8), half_cap, max_tb))
    Bp = _round_up(B, tb)

    # --- padding (only when shapes are not tile-aligned) --------------------
    if Bp != B or Dp2 != D:
        xf = jnp.pad(xf, ((0, Bp - B), (0, Dp2 - D)))
    y2 = y.reshape(B, 1).astype(jnp.float32)
    if Bp != B:
        y2 = jnp.pad(y2, ((0, Bp - B), (0, 0)))
    wb = jnp.pad(w.astype(jnp.bfloat16), ((0, Dp2 - D), (0, Mp - M)))
    b2 = jnp.pad(b.reshape(1, M).astype(jnp.float32), ((0, 0), (0, Mp - M)))
    post_row = jnp.pad(pvec.reshape(1, M), ((0, 0), (0, Mp - M)))

    out_shape = (jax.ShapeDtypeStruct((Bp, Mp), jnp.float32),
                 jax.ShapeDtypeStruct((Bp, 128), jnp.float32))

    if whole_d:
        grid = (Bp // tb,)
        w_bytes = Dp2 * Mp * 2
        out_full, stats_full = pl.pallas_call(
            _mv_vote_whole_d_kernel,
            out_shape=out_shape,
            grid_spec=pltpu.PrefetchScalarGridSpec(
                num_scalar_prefetch=0,
                grid=grid,
                in_specs=[
                    pl.BlockSpec((tb, Dp2), lambda i: (i, 0)),   # x (f32 stream)
                    pl.BlockSpec((Dp2, Mp), lambda i: (0, 0)),   # w (resident)
                    pl.BlockSpec((1, Mp), lambda i: (0, 0)),     # b (resident)
                    pl.BlockSpec((1, Mp), lambda i: (0, 0)),     # post (resident)
                    pl.BlockSpec((tb, 1), lambda i: (i, 0)),     # y
                ],
                out_specs=[
                    pl.BlockSpec((tb, Mp), lambda i: (i, 0)),    # votes
                    pl.BlockSpec((tb, 128), lambda i: (i, 0)),   # stats slab
                ],
            ),
            compiler_params=pltpu.CompilerParams(
                dimension_semantics=("parallel",)),
            cost_estimate=pl.CostEstimate(
                flops=2 * Bp * Dp2 * Mp,
                transcendentals=0,
                bytes_accessed=(Bp * Dp2 * 4 + w_bytes + 2 * Mp * 4 + Bp * 4
                                + Bp * Mp * 4 + Bp * 128 * 4)),
        )(xf, wb, b2, post_row, y2)
    else:
        grid = (Bp // tb, Dp2 // tk)
        w_bytes = (Bp // tb) * Dp2 * Mp * 2
        out_full, stats_full = pl.pallas_call(
            _mv_vote_kred_kernel,
            out_shape=out_shape,
            grid_spec=pltpu.PrefetchScalarGridSpec(
                num_scalar_prefetch=0,
                grid=grid,
                in_specs=[
                    pl.BlockSpec((tb, tk), lambda i, k: (i, k)),   # x (streamed)
                    pl.BlockSpec((tk, Mp), lambda i, k: (k, 0)),   # w
                    pl.BlockSpec((1, Mp), lambda i, k: (0, 0)),    # b
                    pl.BlockSpec((1, Mp), lambda i, k: (0, 0)),    # post
                    pl.BlockSpec((tb, 1), lambda i, k: (i, 0)),    # y
                ],
                out_specs=[
                    pl.BlockSpec((tb, Mp), lambda i, k: (i, 0)),
                    pl.BlockSpec((tb, 128), lambda i, k: (i, 0)),
                ],
                scratch_shapes=[pltpu.VMEM((tb, Mp), jnp.float32)],
            ),
            compiler_params=pltpu.CompilerParams(
                dimension_semantics=("parallel", "arbitrary")),
            cost_estimate=pl.CostEstimate(
                flops=2 * Bp * Dp2 * Mp,
                transcendentals=0,
                bytes_accessed=(Bp * Dp2 * 4 + w_bytes + 2 * Mp * 4 + Bp * 4
                                + Bp * Mp * 4 + Bp * 128 * 4)),
        )(xf, wb, b2, post_row, y2)

    # Padded rows (Bp > B) / padded voter columns contain garbage and must be
    # sliced off here -- never consume out_full/stats_full directly.
    out = out_full[:B, :M]
    margin = stats_full[:B, 0:1]
    pred = stats_full[:B, 1:2]
    score = stats_full[:B, 2:4]
    post = pvec.reshape(M, 1)           # torch convention: (n_voters, 1)
    return out, margin, score, pred, post, kl


if __name__ == "__main__":
    key = jax.random.PRNGKey(0)
    kx, kw, kb, ky, kp = jax.random.split(key, 5)

    B, Cch, H, Wsp = 64, 4, 16, 16          # batch['x'] : (B, C, H, W)
    M = 16                                  # number of voters
    D = Cch * H * Wsp

    x = jax.random.normal(kx, (B, Cch, H, Wsp), dtype=jnp.float32)
    y = jax.random.randint(ky, (B, 1), 0, 2).astype(jnp.float32)
    assert bool(jnp.all((y == 0.0) | (y == 1.0)))   # binary-label constraint

    # synthetic majority vote (binary linear voters), deterministic init
    w = 0.05 * jax.random.normal(kw, (D, M), dtype=jnp.float32)
    b = 0.05 * jax.random.normal(kb, (M,), dtype=jnp.float32)

    # module params: prior = 1/n_voters, post_ initialized from the prior
    prior = jnp.full((M,), 1.0 / M, dtype=jnp.float32)
    post_logits = prior + 0.1 * jax.random.normal(kp, (M,), dtype=jnp.float32)

    # whole-D path (grid (2,): batch split in two so both v7x TCs are used)
    fwd = jax.jit(majority_vote_diff_forward)
    res_whole = jax.block_until_ready(fwd(x, y, w, b, post_logits, prior))

    # k-reduction fallback path (forced): grid (2, 2), exercises acc scratch
    fwd_kred = jax.jit(functools.partial(majority_vote_diff_forward,
                                         tk=512, force_kred=True))
    res_kred = jax.block_until_ready(fwd_kred(x, y, w, b, post_logits, prior))

    # ---------------- pure-JAX reference for correctness --------------------
    xf = x.reshape(B, -1)
    x_bf = xf.astype(jnp.bfloat16).astype(jnp.float32)
    w_bf = w.astype(jnp.bfloat16).astype(jnp.float32)
    logits_r = x_bf @ w_bf + b
    post_r = jax.nn.softmax(jnp.clip(post_logits, -1e10, 1e10)).reshape(M, 1)
    kl_r = (jnp.sum(post_r * jnp.log(post_r))
            - jnp.sum(post_r * jnp.log(prior.reshape(M, 1))))
    classes = jnp.array([0.0, 1.0], dtype=jnp.float32)

    def check(result):
        out, margin, score, pred, post, kl = result
        assert out.shape == (B, M) and margin.shape == (B, 1)
        assert score.shape == (B, 2) and pred.shape == (B, 1)
        assert post.shape == (M, 1)

        # Vote parity: kernel vs reference may only disagree where a logit
        # sits inside the bf16/accumulation-order noise band around zero.
        out_r = (logits_r > 0.0).astype(jnp.float32)
        assert bool(jnp.all((out == out_r) | (jnp.abs(logits_r) < 1e-2)))

        # Validate the reduction stage against the torch formulas applied to
        # the kernel's own votes.
        margin_r = (2.0 * ((out == y).astype(jnp.float32) - 0.5)) @ post_r
        score_r = jnp.concatenate(
            [(out == c).astype(jnp.float32) @ post_r for c in classes], axis=1)
        pred_r = classes[jnp.argmax(score_r, axis=1, keepdims=True)]

        assert jnp.allclose(margin, margin_r, atol=1e-6)
        assert jnp.allclose(score, score_r, atol=1e-6)
        assert jnp.allclose(pred, pred_r)
        assert jnp.allclose(post, post_r, atol=1e-6)
        assert jnp.allclose(kl, kl_r, atol=1e-6)

    check(res_whole)
    check(res_kred)

    print("KERNEL_OK")
</pallas_src>

<mosaic_0001>
module attributes {stable_mosaic.version = 11 : i64} {
  func.func @_mv_vote_whole_d_kernel(%arg0: i32, %arg1: memref<32x1024xf32, #tpu.memory_space<vmem>>, %arg2: memref<1024x128xbf16, #tpu.memory_space<vmem>>, %arg3: memref<1x128xf32, #tpu.memory_space<vmem>>, %arg4: memref<1x128xf32, #tpu.memory_space<vmem>>, %arg5: memref<32x1xf32, #tpu.memory_space<vmem>>, %arg6: memref<32x128xf32, #tpu.memory_space<vmem>>, %arg7: memref<32x128xf32, #tpu.memory_space<vmem>>) attributes {dimension_semantics = [#tpu.dimension_semantics<parallel>], iteration_bounds = array<i64: 2>, scalar_prefetch = 0 : i64, scratch_operands = 0 : i64, tpu.core_type = #tpu.core_type<tc>, window_params = [{transform_indices = @transform_0, window_bounds = array<i64: 32, 1024>}, {pipeline_mode = #tpu.pipeline_mode<synchronous>, transform_indices = @transform_1, window_bounds = array<i64: 1024, 128>}, {pipeline_mode = #tpu.pipeline_mode<synchronous>, transform_indices = @transform_2, window_bounds = array<i64: 1, 128>}, {pipeline_mode = #tpu.pipeline_mode<synchronous>, transform_indices = @transform_3, window_bounds = array<i64: 1, 128>}, {transform_indices = @transform_4, window_bounds = array<i64: 32, 1>}, {transform_indices = @transform_5, window_bounds = array<i64: 32, 128>}, {transform_indices = @transform_6, window_bounds = array<i64: 32, 128>}]} {
    %c0 = arith.constant 0 : index
    %c0_0 = arith.constant 0 : index
    %0 = vector.load %arg1[%c0, %c0_0] : memref<32x1024xf32, #tpu.memory_space<vmem>>, vector<32x1024xf32>
    %1 = arith.truncf %0 : vector<32x1024xf32> to vector<32x1024xbf16>
    %c0_1 = arith.constant 0 : index
    %c0_2 = arith.constant 0 : index
    %2 = vector.load %arg2[%c0_1, %c0_2] : memref<1024x128xbf16, #tpu.memory_space<vmem>>, vector<1024x128xbf16>
    %cst = arith.constant dense<0.000000e+00> : vector<32x128xf32>
    %3 = tpu.matmul %1, %2, %cst {dimension_numbers = #tpu.dot_dimension_numbers<[1], [0], [0], [1], [0, 0, 1, 1], [], []>} : vector<32x1024xbf16>, vector<1024x128xbf16>, vector<32x128xf32> -> vector<32x128xf32>
    %c0_3 = arith.constant 0 : index
    %c0_4 = arith.constant 0 : index
    %4 = vector.load %arg3[%c0_3, %c0_4] : memref<1x128xf32, #tpu.memory_space<vmem>>, vector<1x128xf32>
    %c0_5 = arith.constant 0 : index
    %c0_6 = arith.constant 0 : index
    %5 = vector.load %arg4[%c0_5, %c0_6] : memref<1x128xf32, #tpu.memory_space<vmem>>, vector<1x128xf32>
    %c0_7 = arith.constant 0 : index
    %c0_8 = arith.constant 0 : index
    %6 = vector.load %arg5[%c0_7, %c0_8] : memref<32x1xf32, #tpu.memory_space<vmem>>, vector<32x1xf32>
    %7 = vector.broadcast %4 : vector<1x128xf32> to vector<32x128xf32>
    %8 = arith.addf %3, %7 : vector<32x128xf32>
    %cst_9 = arith.constant 0.000000e+00 : f32
    %9 = vector.broadcast %cst_9 : f32 to vector<32x128xf32>
    %10 = arith.cmpf ogt, %8, %9 : vector<32x128xf32>
    %11 = arith.extui %10 : vector<32x128xi1> to vector<32x128xi32>
    %12 = arith.sitofp %11 : vector<32x128xi32> to vector<32x128xf32>
    %c0_10 = arith.constant 0 : index
    %c0_11 = arith.constant 0 : index
    %13 = vector.load %arg6[%c0_10, %c0_11] : memref<32x128xf32, #tpu.memory_space<vmem>>, vector<32x128xf32>
    tpu.vector_store %arg6[%c0_10, %c0_11], %12 {strides = array<i32>} : memref<32x128xf32, #tpu.memory_space<vmem>>, vector<32x128xf32>,
    %14 = vector.broadcast %5 : vector<1x128xf32> to vector<32x128xf32>
    %15 = arith.mulf %12, %14 : vector<32x128xf32>
    %cst_12 = arith.constant dense<0.000000e+00> : vector<32xf32>
    %16 = vector.multi_reduction <add>, %15, %cst_12 [1] : vector<32x128xf32> to vector<32xf32>
    %17 = vector.shape_cast %16 : vector<32xf32> to vector<32x1xf32>
    %cst_13 = arith.constant 1.000000e+00 : f32
    %18 = vector.broadcast %cst_13 : f32 to vector<32x128xf32>
    %19 = arith.subf %18, %12 : vector<32x128xf32>
    %20 = vector.broadcast %5 : vector<1x128xf32> to vector<32x128xf32>
    %21 = arith.mulf %19, %20 : vector<32x128xf32>
    %cst_14 = arith.constant dense<0.000000e+00> : vector<32xf32>
    %22 = vector.multi_reduction <add>, %21, %cst_14 [1] : vector<32x128xf32> to vector<32xf32>
    %23 = vector.shape_cast %22 : vector<32xf32> to vector<32x1xf32>
    %cst_15 = arith.constant 1.000000e+00 : f32
    %24 = vector.broadcast %cst_15 : f32 to vector<32x1xf32>
    %25 = arith.cmpf oeq, %6, %24 : vector<32x1xf32>
    %26 = arith.subf %17, %23 : vector<32x1xf32>
    %27 = arith.subf %23, %17 : vector<32x1xf32>
    %28 = arith.select %25, %26, %27 : vector<32x1xi1>, vector<32x1xf32>
    %29 = arith.cmpf ogt, %17, %23 : vector<32x1xf32>
    %30 = arith.extui %29 : vector<32x1xi1> to vector<32x1xi32>
    %31 = arith.sitofp %30 : vector<32x1xi32> to vector<32x1xf32>
    %32 = tpu.iota {dimensions = array<i32: 1>} : vector<32x128xi32>
    %c0_i32 = arith.constant 0 : i32
    %33 = vector.broadcast %c0_i32 : i32 to vector<32x128xi32>
    %34 = arith.cmpi eq, %32, %33 : vector<32x128xi32>
    %c1_i32 = arith.constant 1 : i32
    %35 = vector.broadcast %c1_i32 : i32 to vector<32x128xi32>
    %36 = arith.cmpi eq, %32, %35 : vector<32x128xi32>
    %c2_i32 = arith.constant 2 : i32
    %37 = vector.broadcast %c2_i32 : i32 to vector<32x128xi32>
    %38 = arith.cmpi eq, %32, %37 : vector<32x128xi32>
    %c3_i32 = arith.constant 3 : i32
    %39 = vector.broadcast %c3_i32 : i32 to vector<32x128xi32>
    %40 = arith.cmpi eq, %32, %39 : vector<32x128xi32>
    %cst_16 = arith.constant 0.000000e+00 : f32
    %41 = vector.shape_cast %17 : vector<32x1xf32> to vector<32x1xf32>
    %42 = vector.broadcast %41 : vector<32x1xf32> to vector<32x128xf32>
    %43 = vector.broadcast %cst_16 : f32 to vector<32x128xf32>
    %44 = arith.select %40, %42, %43 : vector<32x128xi1>, vector<32x128xf32>
    %45 = vector.shape_cast %23 : vector<32x1xf32> to vector<32x1xf32>
    %46 = vector.broadcast %45 : vector<32x1xf32> to vector<32x128xf32>
    %47 = arith.select %38, %46, %44 : vector<32x128xi1>, vector<32x128xf32>
    %48 = vector.shape_cast %31 : vector<32x1xf32> to vector<32x1xf32>
    %49 = vector.broadcast %48 : vector<32x1xf32> to vector<32x128xf32>
    %50 = arith.select %36, %49, %47 : vector<32x128xi1>, vector<32x128xf32>
    %51 = vector.shape_cast %28 : vector<32x1xf32> to vector<32x1xf32>
    %52 = vector.broadcast %51 : vector<32x1xf32> to vector<32x128xf32>
    %53 = arith.select %34, %52, %50 : vector<32x128xi1>, vector<32x128xf32>
    %c0_17 = arith.constant 0 : index
    %c0_18 = arith.constant 0 : index
    %54 = vector.load %arg7[%c0_17, %c0_18] : memref<32x128xf32, #tpu.memory_space<vmem>>, vector<32x128xf32>
    tpu.vector_store %arg7[%c0_17, %c0_18], %53 {strides = array<i32>} : memref<32x128xf32, #tpu.memory_space<vmem>>, vector<32x128xf32>,
    return
  }
  func.func @transform_0(%arg0: i32) -> (i32, i32) {
    %c0_i32 = arith.constant 0 : i32
    %c0_i32_0 = arith.constant 0 : i32
    return %arg0, %c0_i32 : i32, i32
  }
  func.func @transform_1(%arg0: i32) -> (i32, i32) {
    %c0_i32 = arith.constant 0 : i32
    %c0_i32_0 = arith.constant 0 : i32
    %c0_i32_1 = arith.constant 0 : i32
    return %c0_i32, %c0_i32_0 : i32, i32
  }
  func.func @transform_2(%arg0: i32) -> (i32, i32) {
    %c0_i32 = arith.constant 0 : i32
    %c0_i32_0 = arith.constant 0 : i32
    %c0_i32_1 = arith.constant 0 : i32
    return %c0_i32, %c0_i32_0 : i32, i32
  }
  func.func @transform_3(%arg0: i32) -> (i32, i32) {
    %c0_i32 = arith.constant 0 : i32
    %c0_i32_0 = arith.constant 0 : i32
    %c0_i32_1 = arith.constant 0 : i32
    return %c0_i32, %c0_i32_0 : i32, i32
  }
  func.func @transform_4(%arg0: i32) -> (i32, i32) {
    %c0_i32 = arith.constant 0 : i32
    %c0_i32_0 = arith.constant 0 : i32
    return %arg0, %c0_i32 : i32, i32
  }
  func.func @transform_5(%arg0: i32) -> (i32, i32) {
    %c0_i32 = arith.constant 0 : i32
    %c0_i32_0 = arith.constant 0 : i32
    return %arg0, %c0_i32 : i32, i32
  }
  func.func @transform_6(%arg0: i32) -> (i32, i32) {
    %c0_i32 = arith.constant 0 : i32
    %c0_i32_0 = arith.constant 0 : i32
    return %arg0, %c0_i32 : i32, i32
  }
}

</mosaic_0001>

<bundles_post_ra>
// kernel: majority_vote_diff_forward.1
= control target key start
LH: loop header
LB: loop body
LE: loop exit
PB: predicated region body
PF: predicated region fallthrough
CT: control target
= control target key end

     0   :  { %s1613_s21 = smov 0   ;;  %s1937_s0 = inlined_call_operand.vmem [shape: f32[64,1024], index: 0, kind: input, shape index: {}]   ;;  %s1938_s1 = inlined_call_operand.vmem [shape: bf16[1024,128], index: 1, kind: input, shape index: {}]   ;;  %s1939_s2 = inlined_call_operand.vmem [shape: f32[1,128], index: 2, kind: input, shape index: {}]   ;;  %s1940_s3 = inlined_call_operand.vmem [shape: f32[1,128], index: 3, kind: input, shape index: {}]   ;;  %s1941_s4 = inlined_call_operand.vmem [shape: f32[64,1], index: 4, kind: input, shape index: {}]   ;;  %s1942_s5 = inlined_call_operand.vmem [shape: f32[64,128], index: 5, kind: output, shape index: {0}]   ;;  %s1943_s6 = inlined_call_operand.vmem [shape: f32[64,128], index: 6, kind: output, shape index: {1}]  }
   0x1 LB: > { %s1289_s22 = sadd.s32 4294967295, %s1574_s21   ;;  %p1293_p0 = scmp.ge.s32.totalorder %s1574_s21, 1  ;;  %s1574_s21 = sphi %s1613_s21, %s17_s21  }
   0x2   : > { %p228_p1 = scmp.lt.s32.totalorder %s1574_s21, 3 }
   0x4   : > { %p229_p2 = pnand %p1293_p0, %p228_p1 }
   0x5   : > { %v1504_v0 = vld [vmem:[%s1938_s1 + $0x40] sm:$0xff] (!%p229_p2)   ;;  %v1508_v4 = vld [vmem:[%s1938_s1 + $0x48] sm:$0xff] (!%p229_p2)   ;;  %v1512_v8 = vld [vmem:[%s1938_s1 + $0x50] sm:$0xff] (!%p229_p2)   ;;  %s1294_s9 = sshll.u32 (!%p229_p2), %s1289_s22, 2 }
   0x6   : > { %232 = sbr.rel (%p229_p2) target bundleno = 583 (0x247), region = 40  ;;  %v1505_v1 = vld [vmem:[%s1938_s1 + $0xc0] sm:$0xff] (!%p229_p2)   ;;  %1380 = vmatprep.subr.bf16.mxu0 (!%p229_p2), %v1504_v0  ;;  %v1509_v5 = vld [vmem:[%s1938_s1 + $0xc8] sm:$0xff] (!%p229_p2)   ;;  %v1513_v9 = vld [vmem:[%s1938_s1 + $0xd0] sm:$0xff] (!%p229_p2)   ;;  %p270_p3 = scmp.lt.s32.totalorder (!%p229_p2), %s1294_s9, 7 }
   0x7   : > { %v1506_v2 = vld [vmem:[%s1938_s1] sm:$0xff] (!%p229_p2)   ;;  %1408 = vmatprep.subr.bf16.mxu1 (!%p229_p2), %v1505_v1  ;;  %v1510_v6 = vld [vmem:[%s1938_s1 + $0x8] sm:$0xff] (!%p229_p2)   ;;  %v1514_v10 = vld [vmem:[%s1938_s1 + $0x10] sm:$0xff] (!%p229_p2)  }
   0x8   : > { %v1507_v3 = vld [vmem:[%s1938_s1 + $0x80] sm:$0xff] (!%p229_p2)   ;;  %1381 = vmatpush3.bf16.msra.mxu0 (!%p229_p2), %v1506_v2  ;;  %v1511_v7 = vld [vmem:[%s1938_s1 + $0x88] sm:$0xff] (!%p229_p2)   ;;  %v1515_v11 = vld [vmem:[%s1938_s1 + $0x90] sm:$0xff] (!%p229_p2)  }
   0x9   : > { %1409 = vmatpush3.bf16.msra.mxu1 (!%p229_p2), %v1507_v3  ;;  %1382 = vmatprep.subr.bf16.mxu0 (!%p229_p2), %v1508_v4  ;;  %v1516_v12 = vld [vmem:[%s1938_s1 + $0x58] sm:$0xff] (!%p229_p2)   ;;  %v1520_v16 = vld [vmem:[%s1938_s1 + $0x60] sm:$0xff] (!%p229_p2)   ;;  %v1524_v20 = vld [vmem:[%s1938_s1 + $0x68] sm:$0xff] (!%p229_p2)  }
   0xa   : > { %1410 = vmatprep.subr.bf16.mxu1 (!%p229_p2), %v1509_v5  ;;  %v1517_v13 = vld [vmem:[%s1938_s1 + $0xd8] sm:$0xff] (!%p229_p2)   ;;  %v1521_v17 = vld [vmem:[%s1938_s1 + $0xe0] sm:$0xff] (!%p229_p2)   ;;  %v1525_v21 = vld [vmem:[%s1938_s1 + $0xe8] sm:$0xff] (!%p229_p2)  }
   0xb   : > { %v1518_v14 = vld [vmem:[%s1938_s1 + $0x18] sm:$0xff] (!%p229_p2)   ;;  %v1522_v18 = vld [vmem:[%s1938_s1 + $0x20] sm:$0xff] (!%p229_p2)   ;;  %v1526_v22 = vld [vmem:[%s1938_s1 + $0x28] sm:$0xff] (!%p229_p2)  }
   0xc   : > { %1383 = vmatpush3.bf16.msra.mxu0 (!%p229_p2), %v1510_v6  ;;  %v1519_v15 = vld [vmem:[%s1938_s1 + $0x98] sm:$0xff] (!%p229_p2)   ;;  %v1523_v19 = vld [vmem:[%s1938_s1 + $0xa0] sm:$0xff] (!%p229_p2)   ;;  %v1527_v23 = vld [vmem:[%s1938_s1 + $0xa8] sm:$0xff] (!%p229_p2)  }
   0xd   : > { %1411 = vmatpush3.bf16.msra.mxu1 %v1511_v7  ;;  %1384 = vmatprep.subr.bf16.mxu0 %v1512_v8  ;;  %s1945_s9 = smov (!%p270_p3, %s1294_s9), 7  ;;  %v1528_v24 = vld [vmem:[%s1938_s1 + $0x70] sm:$0xff]   ;;  %v1532_v28 = vld [vmem:[%s1938_s1 + $0x78] sm:$0xff]   ;;  %v1536_v44 = vld [vmem:[%s1938_s1 + $0x140] sm:$0xff]  }
   0xe   : > { %1412 = vmatprep.subr.bf16.mxu1 %v1513_v9  ;;  %v1529_v25 = vld [vmem:[%s1938_s1 + $0xf0] sm:$0xff]   ;;  %s1379_s10 = sshll.u32 %s1945_s9, 6  ;;  %v1533_v29 = vld [vmem:[%s1938_s1 + $0xf8] sm:$0xff]   ;;  %v1537_v45 = vld [vmem:[%s1938_s1 + $0x1c0] sm:$0xff]  }
   0xf   : > { %v1530_v26 = vld [vmem:[%s1938_s1 + $0x30] sm:$0xff]   ;;  %s1719_s18 = scalar_lea.vmem %s1937_s0, %s1379_s10  ;;  %v1534_v30 = vld [vmem:[%s1938_s1 + $0x38] sm:$0xff]   ;;  %v1538_v46 = vld [vmem:[%s1938_s1 + $0x100] sm:$0xff]  }
  0x10   : > { %1385 = vmatpush3.bf16.msra.mxu0 %v1514_v10  ;;  %v1531_v27 = vld [vmem:[%s1938_s1 + $0xb0] sm:$0xff]   ;;  %v1535_v31 = vld [vmem:[%s1938_s1 + $0xb8] sm:$0xff]   ;;  %v296_v32 = vld [vmem:[%s1719_s18 + $0x8] sm:$0xff] }
  0x11   : > { %1413 = vmatpush3.bf16.msra.mxu1 %v1515_v11  ;;  %1386 = vmatprep.subr.bf16.mxu0 %v1516_v12  ;;  %v304_v33 = vld [vmem:[%s1719_s18 + $0x48] sm:$0xff]  ;;  %v298_v34 = vld [vmem:[%s1719_s18 + $0x18] sm:$0xff]  ;;  %v295_v37 = vld [vmem:[%s1719_s18] sm:$0xff] }
  0x12   : > { %1414 = vmatprep.subr.bf16.mxu1 %v1517_v13  ;;  %v328_v35 = vpack.c.bf16 %v304_v33, %v296_v32  ;;  %v306_v36 = vld [vmem:[%s1719_s18 + $0x58] sm:$0xff]  ;;  %v303_v38 = vld [vmem:[%s1719_s18 + $0x40] sm:$0xff]  ;;  %v297_v41 = vld [vmem:[%s1719_s18 + $0x10] sm:$0xff] }
  0x13   : > { %v330_v39 = vpack.c.bf16 %v306_v36, %v298_v34  ;;  %v327_v40 = vpack.c.bf16 %v303_v38, %v295_v37  ;;  %v305_v42 = vld [vmem:[%s1719_s18 + $0x50] sm:$0xff]  ;;  %v1539_v47 = vld [vmem:[%s1938_s1 + $0x180] sm:$0xff]   ;;  %v1540_v48 = vld [vmem:[%s1938_s1 + $0x148] sm:$0xff]  }
  0x14   : > { %1387 = vmatpush3.bf16.msra.mxu0 %v1518_v14  ;;  %899 = vmatprep.mubr.bf16.mxu0 %v328_v35  ;;  %v329_v43 = vpack.c.bf16 %v305_v42, %v297_v41  ;;  %v1541_v49 = vld [vmem:[%s1938_s1 + $0x1c8] sm:$0xff]   ;;  %v1544_v52 = vld [vmem:[%s1938_s1 + $0x150] sm:$0xff]   ;;  %v1548_v56 = vld [vmem:[%s1938_s1 + $0x158] sm:$0xff]  }
  0x15   : > { %1415 = vmatpush3.bf16.msra.mxu1 %v1519_v15  ;;  %1388 = vmatprep.subr.bf16.mxu0 %v1520_v16  ;;  %v1542_v50 = vld [vmem:[%s1938_s1 + $0x108] sm:$0xff]   ;;  %v1545_v53 = vld [vmem:[%s1938_s1 + $0x1d0] sm:$0xff]   ;;  %v1549_v57 = vld [vmem:[%s1938_s1 + $0x1d8] sm:$0xff]  }
  0x16   : > { %1416 = vmatprep.subr.bf16.mxu1 %v1521_v17  ;;  %948 = vmatprep.mubr.bf16.mxu1 %v330_v39  ;;  %v1543_v51 = vld [vmem:[%s1938_s1 + $0x188] sm:$0xff]   ;;  %v1546_v54 = vld [vmem:[%s1938_s1 + $0x110] sm:$0xff]   ;;  %v1550_v58 = vld [vmem:[%s1938_s1 + $0x118] sm:$0xff]  }
  0x17   : > { %v1547_v55 = vld [vmem:[%s1938_s1 + $0x190] sm:$0xff]   ;;  %v1551_v59 = vld [vmem:[%s1938_s1 + $0x198] sm:$0xff]   ;;  %v1552_v60 = vld [vmem:[%s1938_s1 + $0x160] sm:$0xff]  }
  0x18   : > { %1389 = vmatpush3.bf16.msra.mxu0 %v1522_v18  ;;  %v1553_v61 = vld [vmem:[%s1938_s1 + $0x1e0] sm:$0xff]   ;;  %v312_v0 = vld [vmem:[%s1719_s18 + $0x88] sm:$0xff]  ;;  %v314_v10 = vld [vmem:[%s1719_s18 + $0x98] sm:$0xff] }
  0x19   : > { %1417 = vmatpush3.bf16.msra.mxu1 %v1523_v19  ;;  %1390 = vmatprep.subr.bf16.mxu0 %v1524_v20  ;;  %v1554_v62 = vld [vmem:[%s1938_s1 + $0x120] sm:$0xff]   ;;  %v320_v1 = vld [vmem:[%s1719_s18 + $0xc8] sm:$0xff]  ;;  %v322_v11 = vld [vmem:[%s1719_s18 + $0xd8] sm:$0xff] }
  0x1a   : > { %1418 = vmatprep.subr.bf16.mxu1 %v1525_v21  ;;  %v1555_v63 = vld [vmem:[%s1938_s1 + $0x1a0] sm:$0xff]   ;;  %v336_v2 = vpack.c.bf16 %v320_v1, %v312_v0  ;;  %v1556_v3 = vld [vmem:[%s1938_s1 + $0x168] sm:$0xff]   ;;  %v313_v12 = vld [vmem:[%s1719_s18 + $0x90] sm:$0xff]  ;;  %v338_v13 = vpack.c.bf16 %v322_v11, %v314_v10 }
  0x1b   : > { %v1557_v4 = vld [vmem:[%s1938_s1 + $0x1e8] sm:$0xff]   ;;  %v311_v5 = vld [vmem:[%s1719_s18 + $0x80] sm:$0xff]  ;;  %v321_v14 = vld [vmem:[%s1719_s18 + $0xd0] sm:$0xff] }
  0x1c   : > { %1391 = vmatpush3.bf16.msra.mxu0 %v1526_v22  ;;  %v319_v6 = vld [vmem:[%s1719_s18 + $0xc0] sm:$0xff]  ;;  %v1558_v8 = vld [vmem:[%s1938_s1 + $0x128] sm:$0xff]   ;;  %v337_v15 = vpack.c.bf16 %v321_v14, %v313_v12  ;;  %v1560_v16 = vld [vmem:[%s1938_s1 + $0x170] sm:$0xff]  }
  0x1d   : > { %1419 = vmatpush3.bf16.msra.mxu1 %v1527_v23  ;;  %1392 = vmatprep.subr.bf16.mxu0 %v1528_v24  ;;  %v335_v7 = vpack.c.bf16 %v319_v6, %v311_v5  ;;  %v1559_v9 = vld [vmem:[%s1938_s1 + $0x1a8] sm:$0xff]   ;;  %v1561_v17 = vld [vmem:[%s1938_s1 + $0x1f0] sm:$0xff]   ;;  %v1564_v20 = vld [vmem:[%s1938_s1 + $0x178] sm:$0xff]  }
  0x1e   : > { %1420 = vmatprep.subr.bf16.mxu1 %v1529_v25  ;;  %v1562_v18 = vld [vmem:[%s1938_s1 + $0x130] sm:$0xff]   ;;  %v1565_v21 = vld [vmem:[%s1938_s1 + $0x1f8] sm:$0xff]   ;;  %v300_v24 = vld [vmem:[%s1719_s18 + $0x28] sm:$0xff] }
  0x1f   : > { %v1563_v19 = vld [vmem:[%s1938_s1 + $0x1b0] sm:$0xff]   ;;  %v1566_v22 = vld [vmem:[%s1938_s1 + $0x138] sm:$0xff]   ;;  %v308_v25 = vld [vmem:[%s1719_s18 + $0x68] sm:$0xff] }
  0x20   : > { %1393 = vmatpush3.bf16.msra.mxu0 %v1530_v26  ;;  %v1567_v23 = vld [vmem:[%s1938_s1 + $0x1b8] sm:$0xff]   ;;  %v332_v26 = vpack.c.bf16 %v308_v25, %v300_v24  ;;  %v301_v32 = vld [vmem:[%s1719_s18 + $0x30] sm:$0xff]  ;;  %v316_v36 = vld [vmem:[%s1719_s18 + $0xa8] sm:$0xff] }
  0x21   : > { %1421 = vmatpush3.bf16.msra.mxu1 %v1531_v27  ;;  %1394 = vmatprep.subr.bf16.mxu0 %v1532_v28  ;;  %v302_v27 = vld [vmem:[%s1719_s18 + $0x38] sm:$0xff]  ;;  %v309_v33 = vld [vmem:[%s1719_s18 + $0x70] sm:$0xff]  ;;  %v324_v37 = vld [vmem:[%s1719_s18 + $0xe8] sm:$0xff] }
  0x22   : > { %1422 = vmatprep.subr.bf16.mxu1 %v1533_v29  ;;  %v310_v28 = vld [vmem:[%s1719_s18 + $0x78] sm:$0xff]  ;;  %v299_v29 = vld [vmem:[%s1719_s18 + $0x20] sm:$0xff]  ;;  %v333_v35 = vpack.c.bf16 %v309_v33, %v301_v32  ;;  %v340_v39 = vpack.c.bf16 %v324_v37, %v316_v36 }
  0x23   : > { %v318_v38 = vld [vmem:[%s1719_s18 + $0xb8] sm:$0xff]  ;;  %v315_v42 = vld [vmem:[%s1719_s18 + $0xa0] sm:$0xff] }
  0x24   : > { %1395 = vmatpush3.bf16.msra.mxu0 %v1534_v30  ;;  %v334_v30 = vpack.c.bf16 %v310_v28, %v302_v27  ;;  %v1372_v32 = vld [vmem:[%s1940_s3] ss:$0 sm:$0xff] }
  0x25   : > { %1423 = vmatpush3.bf16.msra.mxu1 %v1535_v31  ;;  %1436 = vmatprep.subr.bf16.mxu0 %v1536_v44  ;;  %v307_v31 = vld [vmem:[%s1719_s18 + $0x60] sm:$0xff]  ;;  %v317_v44 = vld [vmem:[%s1719_s18 + $0xb0] sm:$0xff] }
  0x26   : > { %1464 = vmatprep.subr.bf16.mxu1 %v1537_v45  ;;  %v331_v34 = vpack.c.bf16 %v307_v31, %v299_v29  ;;  %v325_v45 = vld [vmem:[%s1719_s18 + $0xf0] sm:$0xff] }
  0x27   : > { %900 = vmatmul.mubr.bf16.vlgmr.msra.gmra.mrb[0].mxu0 %v327_v40  ;;  %v326_v40 = vld [vmem:[%s1719_s18 + $0xf8] sm:$0xff] }
  0x28   : > { %949 = vmatmul.mubr.bf16.vlgmr.msra.gmra.mrb[0].mxu1 %v329_v43  ;;  %1437 = vmatpush3.bf16.msra.mxu0 %v1538_v46  ;;  %v342_v41 = vpack.c.bf16 %v326_v40, %v318_v38  ;;  %v323_v43 = vld [vmem:[%s1719_s18 + $0xe0] sm:$0xff]  ;;  %s1859_s18 = sshll.u32 %s1945_s9, 3  ;;  %v1576_v38 = vmov 0.0  }
  0x29   : > { %1465 = vmatpush3.bf16.msra.mxu1 %v1539_v47  ;;  %1438 = vmatprep.subr.bf16.mxu0 %v1540_v48  ;;  %v339_v46 = vpack.c.bf16 %v323_v43, %v315_v42  ;;  %v341_v47 = vpack.c.bf16 %v325_v45, %v317_v44  ;;  %s1865_s30 = scalar_lea.vmem %s1942_s5, %s1859_s18  ;;  %s1884_s11 = scalar_lea.vmem %s1941_s4, %s1859_s18 }
  0x2a   : > { %1466 = vmatprep.subr.bf16.mxu1 %v1541_v49  ;;  %907 = vmatprep.mubr.bf16.mxu0 %v336_v2  ;;  %s292_s14 = scalar_lea.vmem %s1943_s6, %s1859_s18 }
  0x2b   : > { %956 = vmatprep.mubr.bf16.mxu1 %v338_v13 }
  0x2c   : > { %1439 = vmatpush3.bf16.msra.mxu0 %v1542_v50  ;;  %v1303_v50 = vld [vmem:[%s1939_s2] ss:$0 sm:$0xff] }
  0x2d   : > { %1467 = vmatpush3.bf16.msra.mxu1 %v1543_v51  ;;  %1440 = vmatprep.subr.bf16.mxu0 %v1544_v52 }
  0x2e   : > { %1468 = vmatprep.subr.bf16.mxu1 %v1545_v53 }
  0x2f   : > { %908 = vmatmul.mubr.bf16.gmra.mrb[4].mxu0 %v335_v7 }
  0x30   : > { %1441 = vmatpush3.bf16.msra.mxu0 %v1546_v54  ;;  %957 = vmatmul.mubr.bf16.gmra.mrb[4].mxu1 %v337_v15 }
  0x31   : > { %1469 = vmatpush3.bf16.msra.mxu1 %v1547_v55  ;;  %1442 = vmatprep.subr.bf16.mxu0 %v1548_v56 }
  0x32   : > { %1470 = vmatprep.subr.bf16.mxu1 %v1549_v57  ;;  %997 = vmatprep.mubr.bf16.mxu0 %v332_v26 }
  0x33   : > { %1046 = vmatprep.mubr.bf16.mxu1 %v334_v30 }
  0x34   : > { %1443 = vmatpush3.bf16.msra.mxu0 %v1550_v58 }
  0x35   : > { %1471 = vmatpush3.bf16.msra.mxu1 %v1551_v59  ;;  %1444 = vmatprep.subr.bf16.mxu0 %v1552_v60 }
  0x36   : > { %1472 = vmatprep.subr.bf16.mxu1 %v1553_v61 }
  0x38   : > { %1445 = vmatpush3.bf16.msra.mxu0 %v1554_v62 }
  0x39   : > { %1473 = vmatpush3.bf16.msra.mxu1 %v1555_v63  ;;  %1446 = vmatprep.subr.bf16.mxu0 %v1556_v3 }
  0x3a   : > { %1474 = vmatprep.subr.bf16.mxu1 %v1557_v4 }
  0x3c   : > { %1447 = vmatpush3.bf16.msra.mxu0 %v1558_v8 }
  0x3d   : > { %1475 = vmatpush3.bf16.msra.mxu1 %v1559_v9  ;;  %1448 = vmatprep.subr.bf16.mxu0 %v1560_v16 }
  0x3e   : > { %1476 = vmatprep.subr.bf16.mxu1 %v1561_v17 }
  0x40   : > { %1449 = vmatpush3.bf16.msra.mxu0 %v1562_v18 }
  0x41   : > { %1477 = vmatpush3.bf16.msra.mxu1 %v1563_v19  ;;  %1450 = vmatprep.subr.bf16.mxu0 %v1564_v20 }
  0x42   : > { %1478 = vmatprep.subr.bf16.mxu1 %v1565_v21 }
  0x44   : > { %1451 = vmatpush3.bf16.msra.mxu0 %v1566_v22 }
  0x45   : > { %1479 = vmatpush3.bf16.msra.mxu1 %v1567_v23 }
  0x47   : > { %998 = vmatmul.mubr.bf16.vlgmr.msra.gmra.mrb[8].mxu0 %v331_v34 }
  0x48   : > { %1047 = vmatmul.mubr.bf16.vlgmr.msra.gmra.mrb[8].mxu1 %v333_v35  ;;  %1005 = vmatprep.mubr.bf16.mxu0 %v340_v39 }
  0x49   : > { %1054 = vmatprep.mubr.bf16.mxu1 %v342_v41 }
  0x4f   : > { %1006 = vmatmul.mubr.bf16.gmra.mrb[12].mxu0 %v339_v46 }
  0x50   : > { %1055 = vmatmul.mubr.bf16.gmra.mrb[12].mxu1 %v341_v47 }
  0xfa   : > { %v1396_v48 = vpop.f32.mrb[0].mxu0 }
  0xfb   : > { %v1424_v49 = vpop.f32.mrb[0].mxu1  ;;  %v1397_v51 = vpop.f32.mrb[1].mxu0 }
  0xfc   : > { %v1398_v52 = vadd.f32 %v1397_v51, %v1396_v48  ;;  %v1425_v53 = vpop.f32.mrb[1].mxu1  ;;  %v1399_v54 = vpop.f32.mrb[2].mxu0 }
  0xfd   : > { %v1426_v55 = vadd.f32 %v1425_v53, %v1424_v49  ;;  %v1427_v56 = vpop.f32.mrb[2].mxu1  ;;  %v1400_v57 = vpop.f32.mrb[3].mxu0 }
  0xfe   : > { %v902_v58 = vadd.f32 %v1398_v52, %v1303_v50  ;;  %v1401_v59 = vadd.f32 %v1400_v57, %v1399_v54  ;;  %v1428_v60 = vpop.f32.mrb[3].mxu1 }
  0xff   : > { %v1429_v61 = vadd.f32 %v1428_v60, %v1427_v56 }
 0x100   : > { %v951_v62 = vadd.f32 %v1426_v55, %v902_v58  ;;  %v905_v63 = vadd.f32 %v1401_v59, %v1303_v50 }
 0x102   : > { %v954_v0 = vadd.f32 %v1429_v61, %v905_v63  ;;  %v1402_v1 = vpop.f32.mrb[4].mxu0 }
 0x103   : > { %v1403_v2 = vpop.f32.mrb[5].mxu0  ;;  %v1430_v7 = vpop.f32.mrb[4].mxu1 }
 0x104   : > { %v1404_v3 = vadd.f32 %v1403_v2, %v1402_v1  ;;  %v1405_v4 = vpop.f32.mrb[6].mxu0  ;;  %v1431_v9 = vpop.f32.mrb[5].mxu1 }
 0x105   : > { %v1406_v5 = vpop.f32.mrb[7].mxu0  ;;  %v1432_v11 = vadd.f32 %v1431_v9, %v1430_v7  ;;  %v1433_v12 = vpop.f32.mrb[6].mxu1  ;;  %v473_v7 = vld [vmem:[%s1884_s11] sm:$0xff]  ;;  %v474_v9 = vld [vmem:[%s1884_s11 + $0x8] sm:$0xff] }
 0x106   : > { %v910_v6 = vadd.f32 %v1404_v3, %v1303_v50  ;;  %v1407_v8 = vadd.f32 %v1406_v5, %v1405_v4  ;;  %v1434_v13 = vpop.f32.mrb[7].mxu1  ;;  %v1577_v3 = vmov 0   ;;  %v1141_v4 = vlaneseq }
 0x107   : > { %v1435_v15 = vadd.f32 %v1434_v13, %v1433_v12  ;;  %1502 = vset.pattern.permute.xlu0 %v1577_v3  ;;  %1503 = vset.pattern.permute.xlu1 %v1577_v3  ;;  %vm1113_vm6 = vcmp.eq.f32.partialorder %v473_v7, 1.0  ;;  %vm1114_vm9 = vcmp.eq.f32.partialorder %v474_v9, 1.0 }
 0x108   : > { %v913_v10 = vadd.f32 %v1407_v8, %v1303_v50  ;;  %v959_v14 = vadd.f32 %v1432_v11, %v910_v6  ;;  %v1878_v5 = vand.u32 127, %v1141_v4 }
 0x10a   : > { %v962_v16 = vadd.f32 %v1435_v15, %v913_v10  ;;  %vm1146_vm4 = vcmp.eq.s32.totalorder %v1878_v5, 3  ;;  %vm1145_vm5 = vcmp.eq.s32.totalorder %v1878_v5, 2  ;;  %vm1144_vm7 = vcmp.eq.s32.totalorder %v1878_v5, 1 }
 0x10b   : > { %vm1143_vm14 = vcmp.eq.s32.totalorder %v1878_v5, 0 }
 0x11a   : > { %v1452_v17 = vpop.f32.mrb[8].mxu0 }
 0x11b   : > { %v1480_v18 = vpop.f32.mrb[8].mxu1  ;;  %v1453_v19 = vpop.f32.mrb[9].mxu0 }
 0x11c   : > { %v1481_v20 = vpop.f32.mrb[9].mxu1  ;;  %v1454_v21 = vadd.f32 %v1453_v19, %v1452_v17  ;;  %v1455_v23 = vpop.f32.mrb[10].mxu0 }
 0x11d   : > { %v1482_v22 = vadd.f32 %v1481_v20, %v1480_v18  ;;  %v1483_v24 = vpop.f32.mrb[10].mxu1  ;;  %v1456_v25 = vpop.f32.mrb[11].mxu0 }
 0x11e   : > { %v1484_v26 = vpop.f32.mrb[11].mxu1  ;;  %v1000_v27 = vadd.f32 %v1454_v21, %v951_v62  ;;  %v1457_v28 = vadd.f32 %v1456_v25, %v1455_v23  ;;  %v475_v21 = vld [vmem:[%s1884_s11 + $0x10] sm:$0xff] }
 0x11f   : > { %v1485_v29 = vadd.f32 %v1484_v26, %v1483_v24  ;;  %vm1115_vm11 = vcmp.eq.f32.partialorder %v475_v21, 1.0 }
 0x120   : > { %v1049_v30 = vadd.f32 %v1482_v22, %v1000_v27  ;;  %v1003_v31 = vadd.f32 %v1457_v28, %v954_v0 }
 0x122   : > { %vm1063_vm0 = vcmp.gt.f32.partialorder %v1049_v30, 0.0  ;;  %v1052_v33 = vadd.f32 %v1485_v29, %v1003_v31  ;;  %v1458_v34 = vpop.f32.mrb[12].mxu0 }
 0x123   : > { %v1486_v35 = vpop.f32.mrb[12].mxu1  ;;  %v1459_v36 = vpop.f32.mrb[13].mxu0  ;;  %v1368_v39 = vsel %vm1063_vm0, 1.0, %v1576_v38 }
 0x124   : > { %v1487_v37 = vpop.f32.mrb[13].mxu1  ;;  %vm1064_vm1 = vcmp.gt.f32.partialorder %v1052_v33, 0.0  ;;  %v1460_v40 = vadd.f32 %v1459_v36, %v1458_v34  ;;  %v1461_v42 = vpop.f32.mrb[14].mxu0  ;;  %v1085_v44 = vmul.f32 %v1372_v32, %v1368_v39  ;;  %1075 = vst [vmem:[%s1865_s30] sm:$0xff] %v1368_v39  ;;  %v1097_v48 = vsub.f32 1.0, %v1368_v39  ;;  %v476_v33 = vld [vmem:[%s1884_s11 + $0x18] sm:$0xff] }
 0x125   : > { %v1488_v41 = vadd.f32 %v1487_v37, %v1486_v35  ;;  %v1489_v43 = vpop.f32.mrb[14].mxu1  ;;  %v1462_v45 = vpop.f32.mrb[15].mxu0  ;;  %v1369_v47 = vsel %vm1064_vm1, 1.0, %v1576_v38  ;;  %vm1116_vm13 = vcmp.eq.f32.partialorder %v476_v33, 1.0 }
 0x126   : > { %v1490_v46 = vpop.f32.mrb[15].mxu1  ;;  %v1008_v49 = vadd.f32 %v1460_v40, %v959_v14  ;;  %v1463_v50 = vadd.f32 %v1462_v45, %v1461_v42  ;;  %1089 = vadd.xlane.f32.xlu0 %v1085_v44  ;;  %v1086_v52 = vmul.f32 %v1372_v32, %v1369_v47  ;;  %1076 = vst [vmem:[%s1865_s30 + $0x8] sm:$0xff] %v1369_v47  ;;  %v1098_v53 = vsub.f32 1.0, %v1369_v47 }
 0x127   : > { %v1491_v51 = vadd.f32 %v1490_v46, %v1489_v43  ;;  %v1101_v56 = vmul.f32 %v1372_v32, %v1097_v48 }
 0x128   : > { %v1057_v54 = vadd.f32 %v1488_v41, %v1008_v49  ;;  %v1011_v55 = vadd.f32 %v1463_v50, %v962_v16  ;;  %1091 = vadd.xlane.f32.xlu1 %v1086_v52  ;;  %v1102_v58 = vmul.f32 %v1372_v32, %v1098_v53 }
 0x12a   : > { %vm1065_vm2 = vcmp.gt.f32.partialorder %v1057_v54, 0.0  ;;  %v1060_v57 = vadd.f32 %v1491_v51, %v1011_v55  ;;  %1105 = vadd.xlane.f32.xlu0 %v1101_v56 }
 0x12b   : > { %v1370_v59 = vsel %vm1065_vm2, 1.0, %v1576_v38 }
 0x12c   : > { %vm1066_vm3 = vcmp.gt.f32.partialorder %v1060_v57, 0.0  ;;  %1107 = vadd.xlane.f32.xlu1 %v1102_v58  ;;  %v1087_v60 = vmul.f32 %v1372_v32, %v1370_v59  ;;  %1077 = vst [vmem:[%s1865_s30 + $0x10] sm:$0xff] %v1370_v59  ;;  %v1099_v61 = vsub.f32 1.0, %v1370_v59 }
 0x12d   : > { %v1371_v62 = vsel %vm1066_vm3, 1.0, %v1576_v38 }
 0x12e   : > { %1093 = vadd.xlane.f32.xlu0 %v1087_v60  ;;  %v1103_v63 = vmul.f32 %v1372_v32, %v1099_v61  ;;  %1078 = vst [vmem:[%s1865_s30 + $0x18] sm:$0xff] %v1371_v62  ;;  %v1100_v0 = vsub.f32 1.0, %v1371_v62  ;;  %v1088_v1 = vmul.f32 %v1372_v32, %v1371_v62 }
 0x130   : > { %1109 = vadd.xlane.f32.xlu1 %v1103_v63  ;;  %v1104_v2 = vmul.f32 %v1372_v32, %v1100_v0 }
 0x132   : > { %1095 = vadd.xlane.f32.xlu0 %v1088_v1 }
 0x134   : > { %1111 = vadd.xlane.f32.xlu1 %v1104_v2 }
 0x1b3   : > { %v1090_v6 = vpop.xlane.xlu0 %1089 }
 0x1b4   : > { %v1147_v10 = vsel %vm1146_vm4, %v1090_v6, 0.0 }
 0x1b5   : > { %v1092_v8 = vpop.xlane.xlu1 %1091 }
 0x1b6   : > { %v1148_v15 = vsel %vm1146_vm4, %v1092_v8, 0.0 }
 0x1b7   : > { %v1106_v11 = vpop.xlane.xlu0 %1105 }
 0x1b8   : > { %v1117_v12 = vsub.f32 %v1090_v6, %v1106_v11  ;;  %v1121_v13 = vsub.f32 %v1106_v11, %v1090_v6  ;;  %vm1129_vm8 = vcmp.gt.f32.partialorder %v1090_v6, %v1106_v11  ;;  %v1151_v14 = vsel %vm1145_vm5, %v1106_v11, %v1147_v10 }
 0x1b9   : > { %v1108_v16 = vpop.xlane.xlu1 %1107  ;;  %v1373_v17 = vsel %vm1129_vm8, 1.0, %v1576_v38 }
 0x1ba   : > { %v1118_v18 = vsub.f32 %v1092_v8, %v1108_v16  ;;  %v1122_v19 = vsub.f32 %v1108_v16, %v1092_v8  ;;  %vm1130_vm10 = vcmp.gt.f32.partialorder %v1092_v8, %v1108_v16  ;;  %v1152_v20 = vsel %vm1145_vm5, %v1108_v16, %v1148_v15 }
 0x1bb   : > { %v1125_v22 = vsel %vm1113_vm6, %v1117_v12, %v1121_v13  ;;  %v1094_v23 = vpop.xlane.xlu0 %1093  ;;  %v1155_v24 = vsel %vm1144_vm7, %v1373_v17, %v1151_v14  ;;  %v1374_v25 = vsel %vm1130_vm10, 1.0, %v1576_v38 }
 0x1bc   : > { %1161 = vperm.xlu0 %1502, %v1125_v22   ;;  %v1149_v26 = vsel %vm1146_vm4, %v1094_v23, 0.0  ;;  %v1126_v27 = vsel %vm1114_vm9, %v1118_v18, %v1122_v19  ;;  %v1156_v28 = vsel %vm1144_vm7, %v1374_v25, %v1152_v20 }
 0x1bd   : > { %1166 = vperm.xlu1 %1503, %v1126_v27   ;;  %v1110_v29 = vpop.xlane.xlu1 %1109 }
 0x1be   : > { %v1119_v30 = vsub.f32 %v1094_v23, %v1110_v29  ;;  %v1123_v31 = vsub.f32 %v1110_v29, %v1094_v23  ;;  %vm1131_vm12 = vcmp.gt.f32.partialorder %v1094_v23, %v1110_v29  ;;  %v1153_v32 = vsel %vm1145_vm5, %v1110_v29, %v1149_v26 }
 0x1bf   : > { %v1375_v34 = vsel %vm1131_vm12, 1.0, %v1576_v38  ;;  %v1096_v37 = vpop.xlane.xlu0 %1095 }
 0x1c0   : > { %v1127_v35 = vsel %vm1115_vm11, %v1119_v30, %v1123_v31  ;;  %v1157_v36 = vsel %vm1144_vm7, %v1375_v34, %v1153_v32  ;;  %v1150_v47 = vsel %vm1146_vm4, %v1096_v37, 0.0 }
 0x1c1   : > { %v1112_v39 = vpop.xlane.xlu1 %1111  ;;  %1171 = vperm.xlu1 %1503, %v1127_v35  }
 0x1c2   : > { %v1120_v40 = vsub.f32 %v1096_v37, %v1112_v39  ;;  %v1124_v41 = vsub.f32 %v1112_v39, %v1096_v37  ;;  %vm1132_vm15 = vcmp.gt.f32.partialorder %v1096_v37, %v1112_v39  ;;  %v1154_v49 = vsel %vm1145_vm5, %v1112_v39, %v1150_v47 }
 0x1c3   : > { %v1376_v51 = vsel %vm1132_vm15, 1.0, %v1576_v38 }
 0x1c4   : > { %v1128_v42 = vsel %vm1116_vm13, %v1120_v40, %v1124_v41  ;;  %v1158_v52 = vsel %vm1144_vm7, %v1376_v51, %v1154_v49 }
 0x1c5   : > { %1176 = vperm.xlu1 %1503, %v1128_v42  }
 0x23b   : > { %v1162_v43 = vpop.permute.xlu0 %1161 }
 0x23c   : > { %v1179_v44 = vsel %vm1143_vm14, %v1162_v43, %v1155_v24  ;;  %v1167_v45 = vpop.permute.xlu1 %1166 }
 0x23d   : > { %1183 = vst [vmem:[%s292_s14] sm:$0xff] %v1179_v44  ;;  %v1180_v46 = vsel %vm1143_vm14, %v1167_v45, %v1156_v28 }
 0x23e   : > { %1184 = vst [vmem:[%s292_s14 + $0x8] sm:$0xff] %v1180_v46 }
 0x240   : > { %v1172_v48 = vpop.permute.xlu1 %1171 }
 0x241   : > { %v1181_v50 = vsel %vm1143_vm14, %v1172_v48, %v1157_v36 }
 0x242   : > { %1185 = vst [vmem:[%s292_s14 + $0x10] sm:$0xff] %v1181_v50 }
 0x244   : > { %v1177_v53 = vpop.permute.xlu1 %1176 }
 0x245   : > { %v1182_v54 = vsel %vm1143_vm14, %v1177_v53, %v1158_v52 }
 0x246   : > { %1186 = vst [vmem:[%s292_s14 + $0x18] sm:$0xff] %v1182_v54 }
 0x247 PF: > { %s17_s21 = sadd.s32 1, %s1574_s21  }
 0x248   : > { %p14_p4 = scmp.ge.s32.totalorder %s17_s21, 4  }
 0x24a   :  { %16 = sbr.rel (!%p14_p4) target bundleno = 1 (0x1), region = 85 }

</bundles_post_ra>
